<compile_context>
chip_gen: v6e
topology: v6e:2x2x1
jax: 0.10.0
libtpu: 0.0.40
codegen_flags: <defaults>
</compile_context>

<pallas_src>
import functools

import jax
import jax.numpy as jnp
from jax import lax
from jax.experimental import pallas as pl
from jax.experimental.pallas import tpu as pltpu


def channel_attention_kernel(x_ref, w1_ref, b1_ref, w2_ref, b2_ref, o_ref,
                             *, inv_len):
    # NOTE(perf): everything below the streaming load/store -- the XLU lane
    # reduce for the mean, the two tiny (Bt,C)x(C,C) MXU dots, the EUP sigmoid
    # and the gate broadcast -- is filler under the HBM-bound roofline.  Do NOT
    # un-fuse the gate into a separate kernel/pass; that would add a second
    # full read of x.
    x = x_ref[...]                                           # (Bt, C, L), input dtype

    # AdaptiveAvgPool1d(1): f32-accumulated mean over the TRUE length.  The
    # block spans the full, un-padded L, so no garbage lanes enter the sum and
    # dividing by 1/L is exact.
    y = jnp.sum(x, axis=-1, dtype=jnp.float32) * inv_len     # (Bt, C) in f32

    # fc[0]: Linear(C, C) + ReLU.  Contract dim 1 of both operands == y @ W1.T
    # (no in-kernel XLU transpose of the weight tile).
    h = lax.dot_general(y, w1_ref[...],
                        dimension_numbers=(((1,), (1,)), ((), ())),
                        preferred_element_type=jnp.float32)
    h = jnp.maximum(h + b1_ref[...].astype(jnp.float32), 0.0)

    # fc[2]: Linear(C, C) + Sigmoid
    s = lax.dot_general(h, w2_ref[...],
                        dimension_numbers=(((1,), (1,)), ((), ())),
                        preferred_element_type=jnp.float32)
    s = jax.nn.sigmoid(s + b2_ref[...].astype(jnp.float32))  # (Bt, C) in f32

    # Channel re-scaling in the input dtype (no f32 copy of the x tile).
    o_ref[...] = (x * s[:, :, None].astype(x.dtype)).astype(o_ref.dtype)


def _vmem_capacity_bytes():
    # Physical VMEM per TensorCore: 128 MiB on v5e/v6e, 64 MiB on v7x.
    try:
        return int(pltpu.get_tpu_info().vmem_capacity_bytes)
    except Exception:
        return 64 << 20   # conservative fallback (v7x-sized budget)


def channel_attention_1d(x, w1, b1, w2, b2, *, b_tile=None):
    B, C, L = x.shape
    if b1.ndim == 1:
        b1 = b1[None, :]
    if b2.ndim == 1:
        b2 = b2[None, :]

    itemsize = jnp.dtype(x.dtype).itemsize
    per_batch_bytes = C * L * itemsize

    vmem_cap = _vmem_capacity_bytes()
    # Budget ~3/8 of physical VMEM for this kernel's pipeline
    # (≈24 MiB on v7x, ≈48 MiB on v5e/v6e), split over 2x(in) + 2x(out) tiles.
    pipeline_budget = (vmem_cap * 3) // 8
    # Larger tiles amortize the ~0.35 us/grid-step fixed cost; at v7x's 3.2 TB/s
    # that matters more, but v7x is also VMEM-capped, so: 8 MiB on v7x,
    # 12 MiB on v5e/v6e.
    tile_target = min(pipeline_budget // 4,
                      (8 << 20) if vmem_cap <= (64 << 20) else (12 << 20))

    auto_tile = b_tile is None
    if auto_tile:
        b_tile = max(1, tile_target // max(1, per_batch_bytes))
    b_tile = max(1, min(b_tile, B))
    if auto_tile and B >= 2:
        # Keep >= 2 grid steps so dimension_semantics=("parallel",) can spread
        # batch tiles across both TensorCores on v7x (harmless on v5e/v6e).
        b_tile = min(b_tile, (B + 1) // 2)

    grid = (pl.cdiv(B, b_tile),)

    tile_bytes = b_tile * per_batch_bytes
    weight_bytes = sum(int(a.size) * jnp.dtype(a.dtype).itemsize
                       for a in (w1, b1, w2, b2))
    # 2x(in tile) + 2x(out tile) + 2x(weights) + headroom for compiler scratch.
    vmem_limit = 4 * tile_bytes + 2 * weight_bytes + (2 << 20)
    vmem_limit = max(vmem_limit, 16 << 20)
    vmem_limit = min(vmem_limit, (vmem_cap * 9) // 10)
    # TODO(synk): if a single batch row (C*L*itemsize) exceeds ~vmem_cap/5 the
    # clamp above degrades buffering; that regime needs a two-phase L-chunked
    # pipeline (pool pass computes the gate, rescale pass streams L tiles).

    kernel = functools.partial(channel_attention_kernel, inv_len=1.0 / L)

    out = pl.pallas_call(
        kernel,
        out_shape=jax.ShapeDtypeStruct((B, C, L), x.dtype),
        grid=grid,
        in_specs=[
            # Full (C, L) extent per block: legal even when C % 8 != 0 or
            # L % 128 != 0 because the last two block dims equal the array
            # dims.  Masked boundary stores beat a wrapper-side pad+slice,
            # which would be an extra full HBM pass over x.
            pl.BlockSpec((b_tile, C, L), lambda b: (b, 0, 0)),   # x batch tile
            pl.BlockSpec((C, C), lambda b: (0, 0)),              # W1 (resident)
            pl.BlockSpec((1, C), lambda b: (0, 0)),              # b1
            pl.BlockSpec((C, C), lambda b: (0, 0)),              # W2 (resident)
            pl.BlockSpec((1, C), lambda b: (0, 0)),              # b2
        ],
        out_specs=pl.BlockSpec((b_tile, C, L), lambda b: (b, 0, 0)),
        compiler_params=pltpu.CompilerParams(
            dimension_semantics=("parallel",),
            vmem_limit_bytes=int(vmem_limit)),
        cost_estimate=pl.CostEstimate(
            flops=int(4 * B * C * C + 2 * B * C * L),
            transcendentals=int(B * C),
            bytes_accessed=int(2 * B * C * L * itemsize + weight_bytes)),
    )(x, w1, b1, w2, b2)

    return out


def reference(x, w1, b1, w2, b2):
    xf = x.astype(jnp.float32)
    y = jnp.mean(xf, axis=-1)
    h = jnp.maximum(y @ w1.astype(jnp.float32).T
                    + b1.reshape(-1).astype(jnp.float32), 0.0)
    s = jax.nn.sigmoid(h @ w2.astype(jnp.float32).T
                       + b2.reshape(-1).astype(jnp.float32))
    return (xf * s[:, :, None]).astype(x.dtype)


if __name__ == "__main__":
    key = jax.random.PRNGKey(0)
    k = jax.random.split(key, 10)

    # ---- Case 1: tiny f32 shapes consistent with the module (B, C, L) --------
    B, C, L = 2, 4, 16
    x = jax.random.normal(k[0], (B, C, L), dtype=jnp.float32)
    bound = 1.0 / float(C) ** 0.5
    # nn.Linear(C, C) weights are (out, in); biases are (C,).
    w1 = jax.random.uniform(k[1], (C, C), jnp.float32, -bound, bound)
    b1 = jax.random.uniform(k[2], (C,), jnp.float32, -bound, bound)
    w2 = jax.random.uniform(k[3], (C, C), jnp.float32, -bound, bound)
    b2 = jax.random.uniform(k[4], (C,), jnp.float32, -bound, bound)

    out = channel_attention_1d(x, w1, b1, w2, b2)
    jax.block_until_ready(out)
    ref = reference(x, w1, b1, w2, b2)
    assert out.shape == (B, C, L)
    assert jnp.allclose(out, ref, atol=1e-5, rtol=1e-5), "f32 mismatch vs reference"

    # ---- Case 2: ragged C/L, partial batch tile, bf16 (masked boundary path) --
    B2, C2, L2 = 3, 5, 200
    bound2 = 1.0 / float(C2) ** 0.5
    x2 = jax.random.normal(k[5], (B2, C2, L2), jnp.float32).astype(jnp.bfloat16)
    w1b = jax.random.uniform(k[6], (C2, C2), jnp.float32, -bound2, bound2).astype(jnp.bfloat16)
    b1b = jax.random.uniform(k[7], (C2,), jnp.float32, -bound2, bound2).astype(jnp.bfloat16)
    w2b = jax.random.uniform(k[8], (C2, C2), jnp.float32, -bound2, bound2).astype(jnp.bfloat16)
    b2b = jax.random.uniform(k[9], (C2,), jnp.float32, -bound2, bound2).astype(jnp.bfloat16)

    # b_tile=2 -> grid of 2 steps with a partial last batch tile.
    out2 = channel_attention_1d(x2, w1b, b1b, w2b, b2b, b_tile=2)
    jax.block_until_ready(out2)
    ref2 = reference(x2, w1b, b1b, w2b, b2b)
    assert out2.shape == (B2, C2, L2)
    assert jnp.allclose(out2.astype(jnp.float32), ref2.astype(jnp.float32),
                        atol=3e-2, rtol=3e-2), "bf16 mismatch vs reference"

    print("KERNEL_OK")
</pallas_src>

<mosaic_0001>
module attributes {stable_mosaic.version = 11 : i64} {
  func.func @channel_attention_kernel(%arg0: i32, %arg1: memref<1x4x16xf32, #tpu.memory_space<vmem>>, %arg2: memref<4x4xf32, #tpu.memory_space<vmem>>, %arg3: memref<1x4xf32, #tpu.memory_space<vmem>>, %arg4: memref<4x4xf32, #tpu.memory_space<vmem>>, %arg5: memref<1x4xf32, #tpu.memory_space<vmem>>, %arg6: memref<1x4x16xf32, #tpu.memory_space<vmem>>) attributes {dimension_semantics = [#tpu.dimension_semantics<parallel>], iteration_bounds = array<i64: 2>, scalar_prefetch = 0 : i64, scratch_operands = 0 : i64, tpu.core_type = #tpu.core_type<tc>, window_params = [{transform_indices = @transform_0, window_bounds = array<i64: 1, 4, 16>}, {pipeline_mode = #tpu.pipeline_mode<synchronous>, transform_indices = @transform_1, window_bounds = array<i64: 4, 4>}, {pipeline_mode = #tpu.pipeline_mode<synchronous>, transform_indices = @transform_2, window_bounds = array<i64: 1, 4>}, {pipeline_mode = #tpu.pipeline_mode<synchronous>, transform_indices = @transform_3, window_bounds = array<i64: 4, 4>}, {pipeline_mode = #tpu.pipeline_mode<synchronous>, transform_indices = @transform_4, window_bounds = array<i64: 1, 4>}, {transform_indices = @transform_5, window_bounds = array<i64: 1, 4, 16>}]} {
    %c0 = arith.constant 0 : index
    %c0_0 = arith.constant 0 : index
    %c0_1 = arith.constant 0 : index
    %0 = vector.load %arg1[%c0, %c0_0, %c0_1] : memref<1x4x16xf32, #tpu.memory_space<vmem>>, vector<1x4x16xf32>
    %cst = arith.constant dense<0.000000e+00> : vector<1x4xf32>
    %1 = vector.multi_reduction <add>, %0, %cst [2] : vector<1x4x16xf32> to vector<1x4xf32>
    %cst_2 = arith.constant 6.250000e-02 : f32
    %2 = vector.broadcast %cst_2 : f32 to vector<1x4xf32>
    %3 = arith.mulf %1, %2 : vector<1x4xf32>
    %c0_3 = arith.constant 0 : index
    %c0_4 = arith.constant 0 : index
    %4 = vector.load %arg2[%c0_3, %c0_4] : memref<4x4xf32, #tpu.memory_space<vmem>>, vector<4x4xf32>
    %cst_5 = arith.constant dense<0.000000e+00> : vector<1x4xf32>
    %5 = tpu.matmul %3, %4, %cst_5 {dimension_numbers = #tpu.dot_dimension_numbers<[1], [1], [0], [0], [0, 0, 1, 0], [], []>} : vector<1x4xf32>, vector<4x4xf32>, vector<1x4xf32> -> vector<1x4xf32>
    %c0_6 = arith.constant 0 : index
    %c0_7 = arith.constant 0 : index
    %6 = vector.load %arg3[%c0_6, %c0_7] : memref<1x4xf32, #tpu.memory_space<vmem>>, vector<1x4xf32>
    %7 = arith.addf %5, %6 : vector<1x4xf32>
    %cst_8 = arith.constant 0.000000e+00 : f32
    %8 = vector.broadcast %cst_8 : f32 to vector<1x4xf32>
    %9 = arith.maximumf %7, %8 : vector<1x4xf32>
    %c0_9 = arith.constant 0 : index
    %c0_10 = arith.constant 0 : index
    %10 = vector.load %arg4[%c0_9, %c0_10] : memref<4x4xf32, #tpu.memory_space<vmem>>, vector<4x4xf32>
    %cst_11 = arith.constant dense<0.000000e+00> : vector<1x4xf32>
    %11 = tpu.matmul %9, %10, %cst_11 {dimension_numbers = #tpu.dot_dimension_numbers<[1], [1], [0], [0], [0, 0, 1, 0], [], []>} : vector<1x4xf32>, vector<4x4xf32>, vector<1x4xf32> -> vector<1x4xf32>
    %c0_12 = arith.constant 0 : index
    %c0_13 = arith.constant 0 : index
    %12 = vector.load %arg5[%c0_12, %c0_13] : memref<1x4xf32, #tpu.memory_space<vmem>>, vector<1x4xf32>
    %13 = arith.addf %11, %12 : vector<1x4xf32>
    %14 = arith.negf %13 : vector<1x4xf32>
    %15 = math.exp %14 : vector<1x4xf32>
    %cst_14 = arith.constant 1.000000e+00 : f32
    %16 = vector.broadcast %cst_14 : f32 to vector<1x4xf32>
    %17 = arith.addf %16, %15 : vector<1x4xf32>
    %18 = arith.divf %16, %17 : vector<1x4xf32>
    %19 = vector.shape_cast %18 : vector<1x4xf32> to vector<1x4x1xf32>
    %20 = vector.broadcast %19 : vector<1x4x1xf32> to vector<1x4x16xf32>
    %21 = arith.mulf %0, %20 : vector<1x4x16xf32>
    %c0_15 = arith.constant 0 : index
    %c0_16 = arith.constant 0 : index
    %c0_17 = arith.constant 0 : index
    %22 = vector.load %arg6[%c0_15, %c0_16, %c0_17] : memref<1x4x16xf32, #tpu.memory_space<vmem>>, vector<1x4x16xf32>
    tpu.vector_store %arg6[%c0_15, %c0_16, %c0_17], %21 {strides = array<i32>} : memref<1x4x16xf32, #tpu.memory_space<vmem>>, vector<1x4x16xf32>,
    return
  }
  func.func @transform_0(%arg0: i32) -> (i32, i32, i32) {
    %c0_i32 = arith.constant 0 : i32
    %c0_i32_0 = arith.constant 0 : i32
    %c0_i32_1 = arith.constant 0 : i32
    return %arg0, %c0_i32, %c0_i32_0 : i32, i32, i32
  }
  func.func @transform_1(%arg0: i32) -> (i32, i32) {
    %c0_i32 = arith.constant 0 : i32
    %c0_i32_0 = arith.constant 0 : i32
    %c0_i32_1 = arith.constant 0 : i32
    return %c0_i32, %c0_i32_0 : i32, i32
  }
  func.func @transform_2(%arg0: i32) -> (i32, i32) {
    %c0_i32 = arith.constant 0 : i32
    %c0_i32_0 = arith.constant 0 : i32
    %c0_i32_1 = arith.constant 0 : i32
    return %c0_i32, %c0_i32_0 : i32, i32
  }
  func.func @transform_3(%arg0: i32) -> (i32, i32) {
    %c0_i32 = arith.constant 0 : i32
    %c0_i32_0 = arith.constant 0 : i32
    %c0_i32_1 = arith.constant 0 : i32
    return %c0_i32, %c0_i32_0 : i32, i32
  }
  func.func @transform_4(%arg0: i32) -> (i32, i32) {
    %c0_i32 = arith.constant 0 : i32
    %c0_i32_0 = arith.constant 0 : i32
    %c0_i32_1 = arith.constant 0 : i32
    return %c0_i32, %c0_i32_0 : i32, i32
  }
  func.func @transform_5(%arg0: i32) -> (i32, i32, i32) {
    %c0_i32 = arith.constant 0 : i32
    %c0_i32_0 = arith.constant 0 : i32
    %c0_i32_1 = arith.constant 0 : i32
    return %arg0, %c0_i32, %c0_i32_0 : i32, i32, i32
  }
}

</mosaic_0001>

<bundles_post_ra>
// kernel: tpu_custom_call.1
= control target key start
LH: loop header
LB: loop body
LE: loop exit
PB: predicated region body
PF: predicated region fallthrough
CT: control target
= control target key end

     0   :  { %10 = vsyncpa [#allocation3], 0  ;;  %s972_s0 = inlined_call_operand.hbm [shape: f32[2,4,16], index: 0, kind: input, shape index: {}]   ;;  %s973_s1 = inlined_call_operand.hbm [shape: f32[4,4], index: 1, kind: input, shape index: {}]   ;;  %s974_s2 = inlined_call_operand.vmem [shape: f32[1,4], index: 2, kind: input, shape index: {}]   ;;  %s975_s3 = inlined_call_operand.vmem [shape: f32[4,4], index: 3, kind: input, shape index: {}]   ;;  %s976_s4 = inlined_call_operand.vmem [shape: f32[1,4], index: 4, kind: input, shape index: {}]   ;;  %s977_s5 = inlined_call_operand.hbm [shape: f32[2,4,16], index: 5, kind: output, shape index: {}]  }
   0x1   :  { %12 = vsyncpa [#allocation3 + $0x1], 0 }
   0x2   :  { %13 = vsyncpa [#allocation6], 0 }
   0x3   :  { %14 = vsyncpa [#allocation4], 0 }
   0x4   :  { %16 = vsyncpa [#allocation4 + $0x1], 0  ;;  %s787_s18 = smov 0   ;;  %s789_s19 = smov 0  }
   0x5   :  { %s791_s20 = smov 0   ;;  %s793_s21 = smov 0  }
   0x6 LB: > { %s808_s22 = sadd.s32 4294967295, %s750_s21   ;;  %s532_s23 = sadd.s32 4294967294, %s750_s21   ;;  %s750_s21 = sphi %s793_s21, %s1000_s21   ;;  %s746_s20 = sphi %s791_s20, %s999_s20   ;;  %s742_s19 = sphi %s789_s19, %s998_s19   ;;  %s738_s18 = sphi %s787_s18, %s997_s18  }
   0x7   : > { %p42_p0 = scmp.ne.s32.totalorder %s742_s19, %s738_s18  ;;  %p978_p1 = scmp.eq.s32.totalorder %s808_s22, 0 }
   0x8   : > { %p156_p3 = scmp.eq.s32.totalorder %s532_s23, 1  ;;  %p533_p5 = scmp.ge.s32.totalorder %s750_s21, 1 }
   0x9   : > { %p817_p4 = por %p978_p1, %p42_p0  ;;  %p163_p7 = scmp.lt.s32.totalorder %s750_s21, 3 }
   0xa   : > { %p822_p6 = por %p156_p3, %p42_p0  ;;  %s752_s27 = smov [#allocation5]  }
   0xb   : > { %s982_s24 = scalar_select %p817_p4, 1, 0 }
   0xc   : > { %s983_s25 = scalar_select %p822_p6, 1, 0 }
   0xd   : > { %p827_p8 = pnand %p533_p5, %p163_p7  ;;  %s176_s28 = sshll.u32 %s752_s27, 4  ;;  %s177_s28 = int_to_ptr.vmem [resolvable:$true] %s176_s28 }
   0xe   : > { %s835_s29 = sadd.s32 1, %s750_s21   ;;  %s29_s8 = sadd.s32 1, %s746_s20 }
   0xf   : > { %s984_s26 = scalar_select %p827_p8, 1, 0 }
  0x10   : > { %p573_p10 = pneg %p827_p8  ;;  %s26_s6 = ssub.s32 %s750_s21, %s835_s29 }
  0x11   : > { %p845_p12 = scmp.eq.s32.totalorder %s26_s6, 0  ;;  %p36_p13 = scmp.ne.s32.totalorder %s746_s20, %s742_s19 }
  0x12   : > { %p839_p11 = pnand %p573_p10, %p978_p1  ;;  %s639_s9 = scalar_lea.vmem %s177_s28, 64 }
  0x13   : > { %p640_p3 = scmp.ne.s32.totalorder %s177_s28, %s639_s9  ;;  %p647_p9 = scmp.lt.s32.totalorder %s177_s28, %s177_s28 }
  0x14   : > { %p630_p0 = pneg %p839_p11  ;;  %p648_p2 = scmp.lt.s32.totalorder %s639_s9, %s639_s9 }
  0x16   : > { %p642_p5 = pnand %p640_p3, %p630_p0  ;;  %p649_p10 = por %p648_p2, %p647_p9 }
  0x18   : > { %p643_p7 = pneg %p642_p5 }
  0x1a   : > { %p650_p1 = pnand %p649_p10, %p643_p7 }
  0x1c   : > { %653 = shalt.err (!%p650_p1)
}
  0x1d   : > { %576 = dma.hbm_to_vmem [thread:$0]  (!%p839_p11), %s973_s1, 64, %s177_s28, [#allocation6]  }
  0x1e   : > { %s862_s12 = scalar_select %p845_p12, %s746_s20, %s29_s8  }
  0x1f   : > { %p37_p1 = scmp.eq.s32.totalorder %s750_s21, 0  ;;  %p987_p2 = scmp.eq.s32.totalorder %s808_s22, 1 }
  0x20   : > { %p586_p0 = scmp.lt.s32.totalorder %s750_s21, 2  ;;  %s196_s14 = sand.u32 1, %s746_s20  }
  0x21   : > { %p870_p9 = por %p987_p2, %p36_p13  ;;  %p38_p3 = por %p37_p1, %p36_p13 }
  0x22   : > { %s536_s15 = sshll.u32 %s196_s14, 2  ;;  %s537_s16 = sshll.u32 %s750_s21, 6 }
  0x23   : > { %s988_s13 = scalar_select %p870_p9, 1, 0 }
  0x24   : > { %s883_s27 = scalar_lea.hbm %s972_s0, %s537_s16  ;;  %s200_s28 = scalar_lea.vmem [#allocation2], %s536_s15 }
  0x25   : > { %s207_s30 = sshll.u32 %s200_s28, 4  ;;  %p885_p11 = pnand %p586_p0, %p38_p3  ;;  %s208_s30 = int_to_ptr.vmem [resolvable:$true] %s207_s30 }
  0x26   : > { %s197_s7 = scalar_lea.sflag [#allocation3], %s196_s14  ;;  %s654_s8 = scalar_lea.hbm %s883_s27, 64 }
  0x27   : > { %p655_p12 = scmp.ne.s32.totalorder %s883_s27, %s654_s8  ;;  %p656_p13 = pneg %p885_p11 }
  0x28   : > { %s659_s11 = scalar_lea.hbm %s972_s0, 128  ;;  %p660_p10 = scmp.lt.s32.totalorder %s883_s27, %s972_s0 }
  0x29   : > { %p657_p5 = pnand %p656_p13, %p655_p12  ;;  %p661_p1 = scmp.lt.s32.totalorder %s659_s11, %s654_s8 }
  0x2b   : > { %p658_p7 = pneg %p657_p5  ;;  %p662_p2 = por %p661_p1, %p660_p10 }
  0x2d   : > { %p663_p0 = pnand %p662_p2, %p658_p7 }
  0x2f   : > { %666 = shalt.err (!%p663_p0)
}
  0x30   : > { %s667_s17 = scalar_lea.vmem %s208_s30, 64  ;;  %s753_s14 = smov [#allocation2]  }
  0x31   : > { %p668_p3 = scmp.ne.s32.totalorder %s208_s30, %s667_s17  ;;  %s672_s23 = sshll.u32 %s753_s14, 4  ;;  %s673_s23 = int_to_ptr.vmem [resolvable:$false] %s672_s23 }
  0x32   : > { %s674_s28 = scalar_lea.vmem %s673_s23, 128  ;;  %p675_p12 = scmp.lt.s32.totalorder %s208_s30, %s673_s23 }
  0x33   : > { %p670_p6 = pnand %p668_p3, %p656_p13  ;;  %p676_p5 = scmp.lt.s32.totalorder %s674_s28, %s667_s17 }
  0x35   : > { %p671_p9 = pneg %p670_p6  ;;  %p677_p4 = por %p676_p5, %p675_p12 }
  0x37   : > { %p678_p8 = pnand %p677_p4, %p671_p9 }
  0x39   : > { %681 = shalt.err (!%p678_p8)
}
  0x3a   : > { %580 = dma.hbm_to_vmem [thread:$0]  (!%p885_p11), %s883_s27, 64, %s208_s30, %s197_s7  }
  0x3b   : > { %p990_p7 = scmp.ne.s32.totalorder %s984_s26, 0 }
  0x3c   : > { %s906_s8 = sand.u32 (!%p990_p7), 1, %s742_s19   ;;  %p991_p4 = scmp.ne.s32.totalorder (!%p990_p7), %s982_s24, 0 }
  0x3d   : > { %216 = sbr.rel (%p990_p7) target bundleno = 770 (0x302), region = 40  ;;  %s539_s9 = sshll.u32 (!%p990_p7), %s906_s8, 2 }
  0x3e   : > { %s219_s10 = scalar_lea.sflag (!%p990_p7), [#allocation3], %s906_s8  ;;  %s222_s11 = scalar_lea.vmem (!%p990_p7), [#allocation2], %s539_s9 }
  0x42   : > { %725 = dma.done.wait (%p991_p4), %s219_s10, 64  }
  0x43   : > { %727 = vsyncadd (%p991_p4), %s219_s10, 4294967232  ;;  %p992_p6 = scmp.eq.s32.totalorder %s808_s22, 0 }
  0x45   : > { %729 = dma.done.wait (%p992_p6), [#allocation6], 64   ;;  %p993_p8 = pmov %p992_p6 }
  0x46   : > { %vm254_vm0 = vcmask 125952   ;;  %v253_v0 = vld [vmem:[%s222_s11] sm:$0xf]  ;;  %v754_v2 = vmov 0.0   ;;  %v259_v3 = vld [vmem:[#allocation5] sm:$0xf]  ;;  %v262_v4 = vlaneseq }
  0x47   : > { %731 = vsyncadd (%p993_p8), [#allocation6], 4294967232  ;;  %v255_v1 = vsel %vm254_vm0, %v253_v0, 0.0  ;;  %555 = vmatprep.subr.mxu0 %v754_v2  ;;  %vm268_vm1 = vcmask 31744   ;;  %560 = vmatprep.subr.mxu1 %v754_v2  ;;  %vm755_vm2 = vmmov 0   ;;  %s548_s16 = sshll.u32 %s808_s22, 6 }
  0x48   : > { %256 = vadd.xlane.f32.xlu0 %v255_v1  ;;  %556 = vmatpush3.xpose.msk.msra.mxu0 %vm268_vm1, %v259_v3  ;;  %v263_v5 = vand.u32 127, %v262_v4  ;;  %v265_v6 = vshrl.u32 %v262_v4, 7  ;;  %v345_v11 = vld [vmem:[%s975_s3] sm:$0xf]  ;;  %s252_s15 = scalar_lea.vmem [#allocation7], %s539_s9  ;;  %s450_s28 = scalar_lea.hbm %s977_s5, %s548_s16 }
  0x49   : > { %557 = vmatprep.mubr.msk.f32.mxu0 %vm755_vm2, %v754_v2  ;;  %562 = vmatprep.mubr.msk.f32.mxu1 %vm755_vm2, %v754_v2  ;;  %v260_v12 = vld [vmem:[%s974_s2] sm:$0x1]  ;;  %s452_s17 = sshll.u32 %s252_s15, 4  ;;  %s439_s10 = scalar_lea.sflag [#allocation4], %s906_s8  ;;  %s453_s17 = int_to_ptr.vmem [resolvable:$true] %s452_s17 }
  0x4a   : > { %v266_v7 = vsub.s32 %v263_v5, %v265_v6  ;;  %561 = vmatpush3.xpose.msk.msra.mxu1 %vm268_vm1, %v345_v11  ;;  %v346_v17 = vld [vmem:[%s976_s4] sm:$0x1]  ;;  %v431_v24 = vsub.s32 0, %v265_v6  ;;  %s682_s11 = scalar_lea.vmem %s453_s17, 64  ;;  %p994_p11 = scmp.ne.s32.totalorder %s988_s13, 0 }
  0x4b   : > { %p683_p9 = scmp.ne.s32.totalorder %s453_s17, %s682_s11  ;;  %s756_s24 = smov [#allocation7]  }
  0x4c   : > { %s686_s22 = sshll.u32 %s756_s24, 4  ;;  %s687_s22 = int_to_ptr.vmem [resolvable:$false] %s686_s22 }
  0x4d   : > { %p684_p13 = pnand %p683_p9, %p994_p11  ;;  %s688_s9 = scalar_lea.vmem %s687_s22, 128 }
  0x4e   : > { %p689_p1 = scmp.lt.s32.totalorder %s453_s17, %s687_s22  ;;  %p690_p2 = scmp.lt.s32.totalorder %s688_s9, %s682_s11 }
  0x4f   : > { %p685_p10 = pneg %p684_p13 }
  0x50   : > { %p691_p0 = por %p690_p2, %p689_p1 }
  0x52   : > { %p692_p3 = pnand %p691_p0, %p685_p10 }
  0xd1   : > { %v257_v8 = vpop.xlane.xlu0 %256 }
  0xd2   : > { %v258_v9 = vmul.f32 0.0625, %v257_v8 }
  0xd4   : > { %v267_v10 = vrot.slane %v258_v9, %v266_v7 }
  0xd6   : > { %558 = vmatmul.mubr.msk.f32.vlgmr.msra.gmra.mxu0 %vm268_vm1, %v267_v10 }
 0x196   : > { %v340_v13 = vpop.f32.mrf.mxu0 }
 0x197   : > { %v341_v14 = vadd.f32 %v340_v13, %v260_v12 }
 0x198   : > { %v559_v15 = vpop.f32.mrf.mxu0 }
 0x199   : > { %v344_v16 = vmax.f32 %v341_v14, 0.0 }
 0x19b   : > { %563 = vmatmul.mubr.msk.f32.vlgmr.msra.gmra.mxu1 %vm268_vm1, %v344_v16 }
 0x25b   : > { %v419_v18 = vpop.f32.mrf.mxu1 }
 0x25c   : > { %v420_v19 = vadd.f32 %v419_v18, %v346_v17 }
 0x25d   : > { %v564_v20 = vpop.f32.mrf.mxu1 }
 0x25e   : > { %v546_v21 = vmul.f32 -1.442695, %v420_v19 }
 0x260   : > { %624 = vpow2.f32 %v546_v21 }
 0x26d   : > { %v625_v22 = vpop.eup %624 }
 0x26e   : > { %v426_v23 = vadd.f32 1.0, %v625_v22 }
 0x270   : > { %626 = vrcp.f32 %v426_v23 }
 0x27d   : > { %v627_v25 = vpop.eup %626 }
 0x27e   : > { %v432_v26 = vrot.slane %v627_v25, %v431_v24 }
 0x280   : > { %434 = vbcast.lane.b32.xlu0 %v432_v26, 256 }
 0x2f2   : > { %v435_v27 = vpop.permute.xlu0 %434 }
 0x2f3   : > { %v436_v28 = vmul.f32 %v435_v27, %v253_v0 }
 0x2f5   : > { %437 = vst.msk [vmem:[%s252_s15] sm:$0xf] %vm254_vm0, %v436_v28 }
 0x2f6   : > { %695 = shalt.err (!%p692_p3)
}
 0x2f7   : > { %s696_s26 = scalar_lea.hbm %s450_s28, 64  ;;  %s700_s30 = scalar_lea.hbm %s977_s5, 128 }
 0x2f8   : > { %p697_p12 = scmp.ne.s32.totalorder %s450_s28, %s696_s26  ;;  %p701_p4 = scmp.lt.s32.totalorder %s450_s28, %s977_s5 }
 0x2f9   : > { %p702_p6 = scmp.lt.s32.totalorder %s700_s30, %s696_s26 }
 0x2fa   : > { %p698_p5 = pnand %p697_p12, %p994_p11 }
 0x2fb   : > { %p703_p8 = por %p702_p6, %p701_p4 }
 0x2fc   : > { %p699_p7 = pneg %p698_p5 }
 0x2fe   : > { %p704_p9 = pnand %p703_p8, %p699_p7 }
 0x300   : > { %707 = shalt.err (!%p704_p9)
}
 0x301   : > { %571 = dma.vmem_to_hbm [thread:$0]  (%p994_p11), %s453_s17, 64, %s450_s28, %s439_s10  }
 0x302 PF: > { %s464_s16 = sand.u32 1, %s738_s18   ;;  %p995_p13 = scmp.ne.s32.totalorder %s983_s25, 0 }
 0x303   : > { %p996_p10 = scmp.ge.s32.totalorder %s750_s21, 2  ;;  %s465_s15 = scalar_lea.sflag [#allocation4], %s464_s16 }
 0x305   : > { %p582_p1 = pnand %p996_p10, %p995_p13 }
 0x307   : > { %p583_p2 = pneg %p582_p1 }
 0x309   : > { %733 = dma.done.wait (%p583_p2), %s465_s15, 64  }
 0x30a   : > { %735 = vsyncadd (%p583_p2), %s465_s15, 4294967232  ;;  %p19_p0 = scmp.ge.s32.totalorder %s835_s29, 4   ;;  %s997_s18 = smov %s742_s19 }
 0x30b   : > { %s998_s19 = smov %s746_s20  ;;  %s999_s20 = smov %s862_s12 }
 0x30c   : > { %s1000_s21 = smov %s835_s29  ;;  %21 = sbr.rel (!%p19_p0) target bundleno = 6 (0x6), region = 89 }
 0x311   :  { %470 = vsyncpa [#allocation3], 1 }
 0x312   :  { %472 = vsyncpa [#allocation3 + $0x1], 1 }
 0x313   :  { %473 = vsyncpa [#allocation6], 1 }
 0x314   :  { %474 = vsyncpa [#allocation4], 1 }
 0x315   :  { %476 = vsyncpa [#allocation4 + $0x1], 1 }

</bundles_post_ra>
